<compile_context>
chip_gen: v5e
topology: v5e:2x2
jax: 0.10.0
libtpu: 0.0.40
codegen_flags: <defaults>
</compile_context>

<pallas_src>
import functools

import jax
import jax.numpy as jnp
from jax.experimental import pallas as pl
from jax.experimental.pallas import tpu as pltpu


def _focal_kernel(preds_ref, labels_ref, alpha_ref, out_ref,
                  acc_loss_ref, acc_cnt_ref,
                  *, gamma, ignore_index, tl, m_total):
    p = pl.program_id(0)            # partial-accumulator ("core") index
    j = pl.program_id(1)            # inner accumulation step
    inner = pl.num_programs(1)

    @pl.when(j == 0)
    def _():
        acc_loss_ref[...] = jnp.zeros_like(acc_loss_ref)
        acc_cnt_ref[...] = jnp.zeros_like(acc_cnt_ref)

    x = preds_ref[...].astype(jnp.float32)            # (C, TL)
    lbl = labels_ref[...]                             # (1, TL) int32
    alpha = alpha_ref[...]                            # (C, 1)  float32

    # log-softmax evaluated only at the label:
    #   logpt = x[lbl] - max - log(sum(exp(x - max)))
    m = jnp.max(x, axis=0, keepdims=True)             # (1, TL)
    s = jnp.sum(jnp.exp(x - m), axis=0, keepdims=True)

    row = jax.lax.broadcasted_iota(jnp.int32, x.shape, 0)     # (C, TL)
    onehot = (row == lbl).astype(jnp.float32)                 # label gather
    xt = jnp.sum(x * onehot, axis=0, keepdims=True)           # (1, TL)
    a_t = jnp.sum(alpha * onehot, axis=0, keepdims=True)      # (1, TL)

    logpt = (xt - m) - jnp.log(s)                     # (1, TL)
    pt = jnp.exp(logpt)
    omp = jnp.maximum(1.0 - pt, 0.0)                  # clamp fp noise at pt ~ 1
    if float(gamma) == int(gamma):
        focal = jax.lax.integer_pow(omp, int(gamma))  # VPU multiplies, no EUP pow
    else:
        focal = jnp.power(omp, jnp.float32(gamma))
    loss = -a_t * focal * logpt                       # (1, TL)

    # mask ignored labels and the ragged tail / overshoot tiles
    col = jax.lax.broadcasted_iota(jnp.int32, lbl.shape, 1)   # (1, TL)
    g_idx = (p * inner + j) * tl + col
    valid = (lbl != ignore_index) & (g_idx < m_total)

    # vector-shaped accumulators: steady-state epilogue is a plain VPU add
    acc_loss_ref[...] += jnp.where(valid, loss, 0.0)
    acc_cnt_ref[...] += jnp.where(valid, 1.0, 0.0)

    @pl.when(j == inner - 1)
    def _():
        lane = jax.lax.broadcasted_iota(jnp.int32, out_ref.shape, 2)
        tot_loss = jnp.sum(acc_loss_ref[...])
        tot_cnt = jnp.sum(acc_cnt_ref[...])
        # lane 0 = masked loss sum, lane 1 = valid-sample count (single unmasked store)
        out_ref[...] = jnp.where(lane == 0, tot_loss,
                                 jnp.where(lane == 1, tot_cnt, 0.0))


def focal_loss_pallas(preds, labels, alpha, *, gamma=2.0, ignore_index=-1,
                      size_average=True, tl=None):
    """preds: [B, N, C] or [B, C] (any float dtype); labels: [B, N] or [B]; alpha: [C]."""
    C = preds.shape[-1]
    preds2 = preds.reshape(-1, C)                         # (M, C), native dtype
    M = preds2.shape[0]
    preds_t = preds2.T                                    # (C, M): lane-dense layout
    labels2 = labels.reshape(1, -1).astype(jnp.int32)     # (1, M)
    alpha2 = jnp.asarray(alpha, jnp.float32).reshape(C, 1)

    if tl is None:
        # biggest lane tile whose preds block stays within a ~4 MiB budget
        # (x2 pipeline buffers + scratch stays well under scoped VMEM on v5e/v6e/v7x)
        itemsize = jnp.dtype(preds.dtype).itemsize
        tl = (4 * 1024 * 1024) // max(1, C * itemsize)
        tl = max(256, min(tl, 8192))
    tl = min(tl, ((M + 127) // 128) * 128)                # don't overshoot tiny inputs
    tl = max(128, (tl // 128) * 128)

    n_tiles = pl.cdiv(M, tl)
    num_parallel = 2 if n_tiles > 1 else 1                # one partial sum per v7x TC
    inner = pl.cdiv(n_tiles, num_parallel)

    def data_map(p, j):
        # clamp overshoot tiles of the last core; their contribution is masked in-kernel
        return (0, jnp.minimum(p * inner + j, n_tiles - 1))

    kernel = functools.partial(_focal_kernel, gamma=float(gamma),
                               ignore_index=int(ignore_index),
                               tl=tl, m_total=M)

    partials = pl.pallas_call(
        kernel,
        out_shape=jax.ShapeDtypeStruct((num_parallel, 1, 128), jnp.float32),
        grid_spec=pltpu.PrefetchScalarGridSpec(
            num_scalar_prefetch=0,
            grid=(num_parallel, inner),
            in_specs=[
                pl.BlockSpec((C, tl), data_map),             # preds tile (lane-dense)
                pl.BlockSpec((1, tl), data_map),             # labels tile
                pl.BlockSpec((C, 1), lambda p, j: (0, 0)),   # alpha (replicated)
            ],
            out_specs=pl.BlockSpec((1, 1, 128), lambda p, j: (p, 0, 0)),
            scratch_shapes=[pltpu.VMEM((1, tl), jnp.float32),   # loss partial sums
                            pltpu.VMEM((1, tl), jnp.float32)],  # valid-count partials
        ),
        compiler_params=pltpu.CompilerParams(
            dimension_semantics=("parallel", "arbitrary"),
            vmem_limit_bytes=32 * 1024 * 1024),
    )(preds_t, labels2, alpha2)

    loss_sum = jnp.sum(partials[:, 0, 0])
    # NOTE: count accumulated in f32 -> exact up to ~16.7M valid rows.
    cnt = jnp.sum(partials[:, 0, 1])
    if size_average:
        return loss_sum / cnt   # NaN if every label == ignore_index (same as reference)
    return loss_sum


def focal_loss_ref(preds, labels, alpha, *, gamma=2.0, ignore_index=-1,
                   size_average=True):
    """Pure-JAX reference mirroring the PyTorch forward (with masking)."""
    C = preds.shape[-1]
    x = preds.reshape(-1, C).astype(jnp.float32)
    lbl = labels.reshape(-1).astype(jnp.int32)
    valid = (lbl != ignore_index)
    safe_lbl = jnp.where(valid, lbl, 0)
    logp = jax.nn.log_softmax(x, axis=-1)
    p = jnp.exp(logp)
    pt = jnp.take_along_axis(p, safe_lbl[:, None], axis=1)[:, 0]
    logpt = jnp.take_along_axis(logp, safe_lbl[:, None], axis=1)[:, 0]
    a_t = jnp.asarray(alpha, jnp.float32)[safe_lbl]
    loss = -a_t * (1.0 - pt) ** gamma * logpt
    loss = jnp.where(valid, loss, 0.0)
    if size_average:
        return jnp.sum(loss) / jnp.sum(valid.astype(jnp.float32))
    return jnp.sum(loss)


if __name__ == "__main__":
    key = jax.random.PRNGKey(0)
    kp, kl, k2p, k2l = jax.random.split(key, 4)

    # --- test 1: detection-style [B, N, C], scalar alpha (module defaults) ---
    num_classes = 2
    alpha_scalar = 0.25
    alpha_vec = jnp.concatenate([
        jnp.array([alpha_scalar], dtype=jnp.float32),
        jnp.full((num_classes - 1,), 1.0 - alpha_scalar, dtype=jnp.float32),
    ])
    B, N, C = 2, 8, num_classes
    preds = jax.random.normal(kp, (B, N, C), dtype=jnp.float32)
    labels = jax.random.randint(kl, (B, N), 0, C, dtype=jnp.int32)
    labels = labels.at[0, 0].set(-1)       # exercise ignore_index

    out = jax.block_until_ready(
        focal_loss_pallas(preds, labels, alpha_vec, gamma=2.0, ignore_index=-1,
                          size_average=True))
    ref = focal_loss_ref(preds, labels, alpha_vec, gamma=2.0, ignore_index=-1,
                         size_average=True)
    assert jnp.allclose(out, ref, rtol=1e-5, atol=1e-6), (out, ref)

    # --- test 1b: non-integer gamma, sum reduction ---
    out_b = jax.block_until_ready(
        focal_loss_pallas(preds, labels, alpha_vec, gamma=1.5, ignore_index=-1,
                          size_average=False))
    ref_b = focal_loss_ref(preds, labels, alpha_vec, gamma=1.5, ignore_index=-1,
                           size_average=False)
    assert jnp.allclose(out_b, ref_b, rtol=1e-5, atol=1e-6), (out_b, ref_b)

    # --- test 2: classification-style [B, C] in bf16, list alpha, multi-tile grid ---
    # (small tl forces several tiles, a ragged tail, and both partial accumulators)
    M2, C2 = 2300, 3
    alpha_list = jnp.array([0.2, 0.3, 0.5], dtype=jnp.float32)
    preds2 = jax.random.normal(k2p, (M2, C2), dtype=jnp.float32).astype(jnp.bfloat16)
    labels2 = jax.random.randint(k2l, (M2,), 0, C2, dtype=jnp.int32)
    labels2 = labels2.at[::7].set(-1)      # sprinkle ignored rows

    out2 = jax.block_until_ready(
        focal_loss_pallas(preds2, labels2, alpha_list, gamma=2.0, ignore_index=-1,
                          size_average=True, tl=256))
    ref2 = focal_loss_ref(preds2, labels2, alpha_list, gamma=2.0, ignore_index=-1,
                          size_average=True)
    assert jnp.allclose(out2, ref2, rtol=1e-4, atol=1e-5), (out2, ref2)

    print("KERNEL_OK")
</pallas_src>

<mosaic_0001>
module attributes {stable_mosaic.version = 11 : i64} {
  func.func @_focal_kernel(%arg0: i32, %arg1: i32, %arg2: memref<2x128xf32, #tpu.memory_space<vmem>>, %arg3: memref<1x128xi32, #tpu.memory_space<vmem>>, %arg4: memref<2x1xf32, #tpu.memory_space<vmem>>, %arg5: memref<1x1x128xf32, #tpu.memory_space<vmem>>, %arg6: memref<1x128xf32, #tpu.memory_space<vmem>>, %arg7: memref<1x128xf32, #tpu.memory_space<vmem>>) attributes {dimension_semantics = [#tpu.dimension_semantics<parallel>, #tpu.dimension_semantics<arbitrary>], iteration_bounds = array<i64: 1, 1>, scalar_prefetch = 0 : i64, scratch_operands = 2 : i64, tpu.core_type = #tpu.core_type<tc>, window_params = [{transform_indices = @transform_0, window_bounds = array<i64: 2, 128>}, {transform_indices = @transform_1, window_bounds = array<i64: 1, 128>}, {pipeline_mode = #tpu.pipeline_mode<synchronous>, transform_indices = @transform_2, window_bounds = array<i64: 2, 1>}, {transform_indices = @transform_3, window_bounds = array<i64: 1, 1, 128>}]} {
    %c0_i32 = arith.constant 0 : i32
    %0 = arith.cmpi eq, %arg1, %c0_i32 : i32
    %1 = arith.extui %0 : i1 to i32
    %c0_i32_0 = arith.constant 0 : i32
    %2 = arith.cmpi ne, %1, %c0_i32_0 : i32
    scf.if %2 {
      %cst_25 = arith.constant 0.000000e+00 : f32
      %63 = vector.broadcast %cst_25 : f32 to vector<1x128xf32>
      %c0_26 = arith.constant 0 : index
      %c0_27 = arith.constant 0 : index
      %64 = vector.load %arg6[%c0_26, %c0_27] : memref<1x128xf32, #tpu.memory_space<vmem>>, vector<1x128xf32>
      tpu.vector_store %arg6[%c0_26, %c0_27], %63 {strides = array<i32>} : memref<1x128xf32, #tpu.memory_space<vmem>>, vector<1x128xf32>,
      %cst_28 = arith.constant 0.000000e+00 : f32
      %65 = vector.broadcast %cst_28 : f32 to vector<1x128xf32>
      %c0_29 = arith.constant 0 : index
      %c0_30 = arith.constant 0 : index
      %66 = vector.load %arg7[%c0_29, %c0_30] : memref<1x128xf32, #tpu.memory_space<vmem>>, vector<1x128xf32>
      tpu.vector_store %arg7[%c0_29, %c0_30], %65 {strides = array<i32>} : memref<1x128xf32, #tpu.memory_space<vmem>>, vector<1x128xf32>,
    } else {
    }
    %c0 = arith.constant 0 : index
    %c0_1 = arith.constant 0 : index
    %3 = vector.load %arg2[%c0, %c0_1] : memref<2x128xf32, #tpu.memory_space<vmem>>, vector<2x128xf32>
    %c0_2 = arith.constant 0 : index
    %c0_3 = arith.constant 0 : index
    %4 = vector.load %arg3[%c0_2, %c0_3] : memref<1x128xi32, #tpu.memory_space<vmem>>, vector<1x128xi32>
    %c0_4 = arith.constant 0 : index
    %c0_5 = arith.constant 0 : index
    %5 = vector.load %arg4[%c0_4, %c0_5] : memref<2x1xf32, #tpu.memory_space<vmem>>, vector<2x1xf32>
    %cst = arith.constant dense<0xFF800000> : vector<128xf32>
    %6 = vector.multi_reduction <maximumf>, %3, %cst [0] : vector<2x128xf32> to vector<128xf32>
    %7 = vector.shape_cast %6 : vector<128xf32> to vector<1x128xf32>
    %8 = vector.broadcast %7 : vector<1x128xf32> to vector<2x128xf32>
    %9 = arith.subf %3, %8 : vector<2x128xf32>
    %10 = math.exp %9 : vector<2x128xf32>
    %cst_6 = arith.constant dense<0.000000e+00> : vector<128xf32>
    %11 = vector.multi_reduction <add>, %10, %cst_6 [0] : vector<2x128xf32> to vector<128xf32>
    %12 = vector.shape_cast %11 : vector<128xf32> to vector<1x128xf32>
    %13 = tpu.iota {dimensions = array<i32: 0>} : vector<2x128xi32>
    %14 = vector.broadcast %4 : vector<1x128xi32> to vector<2x128xi32>
    %15 = arith.cmpi eq, %13, %14 : vector<2x128xi32>
    %16 = arith.extui %15 : vector<2x128xi1> to vector<2x128xi32>
    %17 = arith.sitofp %16 : vector<2x128xi32> to vector<2x128xf32>
    %18 = arith.mulf %3, %17 : vector<2x128xf32>
    %cst_7 = arith.constant dense<0.000000e+00> : vector<128xf32>
    %19 = vector.multi_reduction <add>, %18, %cst_7 [0] : vector<2x128xf32> to vector<128xf32>
    %20 = vector.shape_cast %19 : vector<128xf32> to vector<1x128xf32>
    %21 = vector.broadcast %5 : vector<2x1xf32> to vector<2x128xf32>
    %22 = arith.mulf %21, %17 : vector<2x128xf32>
    %cst_8 = arith.constant dense<0.000000e+00> : vector<128xf32>
    %23 = vector.multi_reduction <add>, %22, %cst_8 [0] : vector<2x128xf32> to vector<128xf32>
    %24 = vector.shape_cast %23 : vector<128xf32> to vector<1x128xf32>
    %25 = arith.subf %20, %7 : vector<1x128xf32>
    %26 = math.log %12 : vector<1x128xf32>
    %27 = arith.subf %25, %26 : vector<1x128xf32>
    %28 = math.exp %27 : vector<1x128xf32>
    %cst_9 = arith.constant 1.000000e+00 : f32
    %29 = vector.broadcast %cst_9 : f32 to vector<1x128xf32>
    %30 = arith.subf %29, %28 : vector<1x128xf32>
    %cst_10 = arith.constant 0.000000e+00 : f32
    %31 = vector.broadcast %cst_10 : f32 to vector<1x128xf32>
    %32 = arith.maximumf %30, %31 : vector<1x128xf32>
    %33 = arith.mulf %32, %32 : vector<1x128xf32>
    %cst_11 = arith.constant 0.000000e+00 : f32
    %34 = vector.broadcast %cst_11 : f32 to vector<1x128xf32>
    %35 = arith.subf %34, %24 : vector<1x128xf32>
    %36 = arith.mulf %35, %33 : vector<1x128xf32>
    %37 = arith.mulf %36, %27 : vector<1x128xf32>
    %38 = tpu.iota {dimensions = array<i32: 1>} : vector<1x128xi32>
    %c1_i32 = arith.constant 1 : i32
    %39 = arith.muli %arg0, %c1_i32 : i32
    %40 = arith.addi %39, %arg1 : i32
    %c128_i32 = arith.constant 128 : i32
    %41 = arith.muli %40, %c128_i32 : i32
    %42 = vector.broadcast %41 : i32 to vector<1x128xi32>
    %43 = arith.addi %42, %38 : vector<1x128xi32>
    %c-1_i32 = arith.constant -1 : i32
    %44 = vector.broadcast %c-1_i32 : i32 to vector<1x128xi32>
    %45 = arith.cmpi ne, %4, %44 : vector<1x128xi32>
    %c16_i32 = arith.constant 16 : i32
    %46 = vector.broadcast %c16_i32 : i32 to vector<1x128xi32>
    %47 = arith.cmpi slt, %43, %46 : vector<1x128xi32>
    %48 = arith.andi %45, %47 : vector<1x128xi1>
    %c0_12 = arith.constant 0 : index
    %c0_13 = arith.constant 0 : index
    %49 = vector.load %arg6[%c0_12, %c0_13] : memref<1x128xf32, #tpu.memory_space<vmem>>, vector<1x128xf32>
    %cst_14 = arith.constant 0.000000e+00 : f32
    %50 = vector.broadcast %cst_14 : f32 to vector<1x128xf32>
    %51 = arith.select %48, %37, %50 : vector<1x128xi1>, vector<1x128xf32>
    %52 = arith.addf %49, %51 : vector<1x128xf32>
    %c0_15 = arith.constant 0 : index
    %c0_16 = arith.constant 0 : index
    %53 = vector.load %arg6[%c0_15, %c0_16] : memref<1x128xf32, #tpu.memory_space<vmem>>, vector<1x128xf32>
    tpu.vector_store %arg6[%c0_15, %c0_16], %52 {strides = array<i32>} : memref<1x128xf32, #tpu.memory_space<vmem>>, vector<1x128xf32>,
    %c0_17 = arith.constant 0 : index
    %c0_18 = arith.constant 0 : index
    %54 = vector.load %arg7[%c0_17, %c0_18] : memref<1x128xf32, #tpu.memory_space<vmem>>, vector<1x128xf32>
    %cst_19 = arith.constant 1.000000e+00 : f32
    %cst_20 = arith.constant 0.000000e+00 : f32
    %55 = vector.broadcast %cst_19 : f32 to vector<1x128xf32>
    %56 = vector.broadcast %cst_20 : f32 to vector<1x128xf32>
    %57 = arith.select %48, %55, %56 : vector<1x128xi1>, vector<1x128xf32>
    %58 = arith.addf %54, %57 : vector<1x128xf32>
    %c0_21 = arith.constant 0 : index
    %c0_22 = arith.constant 0 : index
    %59 = vector.load %arg7[%c0_21, %c0_22] : memref<1x128xf32, #tpu.memory_space<vmem>>, vector<1x128xf32>
    tpu.vector_store %arg7[%c0_21, %c0_22], %58 {strides = array<i32>} : memref<1x128xf32, #tpu.memory_space<vmem>>, vector<1x128xf32>,
    %c0_i32_23 = arith.constant 0 : i32
    %60 = arith.cmpi eq, %arg1, %c0_i32_23 : i32
    %61 = arith.extui %60 : i1 to i32
    %c0_i32_24 = arith.constant 0 : i32
    %62 = arith.cmpi ne, %61, %c0_i32_24 : i32
    scf.if %62 {
      %63 = tpu.iota {dimensions = array<i32: 2>} : vector<1x1x128xi32>
      %c0_25 = arith.constant 0 : index
      %c0_26 = arith.constant 0 : index
      %64 = vector.load %arg6[%c0_25, %c0_26] : memref<1x128xf32, #tpu.memory_space<vmem>>, vector<1x128xf32>
      %65 = vector.shape_cast %64 : vector<1x128xf32> to vector<1x1x128xf32>
      %cst_27 = arith.constant dense<0.000000e+00> : vector<1xf32>
      %66 = vector.multi_reduction <add>, %65, %cst_27 [1, 2] : vector<1x1x128xf32> to vector<1xf32>
      %67 = vector.shape_cast %66 : vector<1xf32> to vector<1x1x1xf32>
      %68 = vector.extract %67[0, 0, 0] : f32 from vector<1x1x1xf32>
      %c0_28 = arith.constant 0 : index
      %c0_29 = arith.constant 0 : index
      %69 = vector.load %arg7[%c0_28, %c0_29] : memref<1x128xf32, #tpu.memory_space<vmem>>, vector<1x128xf32>
      %70 = vector.shape_cast %69 : vector<1x128xf32> to vector<1x1x128xf32>
      %cst_30 = arith.constant dense<0.000000e+00> : vector<1xf32>
      %71 = vector.multi_reduction <add>, %70, %cst_30 [1, 2] : vector<1x1x128xf32> to vector<1xf32>
      %72 = vector.shape_cast %71 : vector<1xf32> to vector<1x1x1xf32>
      %73 = vector.extract %72[0, 0, 0] : f32 from vector<1x1x1xf32>
      %c0_i32_31 = arith.constant 0 : i32
      %74 = vector.broadcast %c0_i32_31 : i32 to vector<1x1x128xi32>
      %75 = arith.cmpi eq, %63, %74 : vector<1x1x128xi32>
      %c1_i32_32 = arith.constant 1 : i32
      %76 = vector.broadcast %c1_i32_32 : i32 to vector<1x1x128xi32>
      %77 = arith.cmpi eq, %63, %76 : vector<1x1x128xi32>
      %cst_33 = arith.constant 0.000000e+00 : f32
      %78 = vector.broadcast %73 : f32 to vector<1x1x128xf32>
      %79 = vector.broadcast %cst_33 : f32 to vector<1x1x128xf32>
      %80 = arith.select %77, %78, %79 : vector<1x1x128xi1>, vector<1x1x128xf32>
      %81 = vector.broadcast %68 : f32 to vector<1x1x128xf32>
      %82 = arith.select %75, %81, %80 : vector<1x1x128xi1>, vector<1x1x128xf32>
      %c0_34 = arith.constant 0 : index
      %c0_35 = arith.constant 0 : index
      %c0_36 = arith.constant 0 : index
      %83 = vector.load %arg5[%c0_34, %c0_35, %c0_36] : memref<1x1x128xf32, #tpu.memory_space<vmem>>, vector<1x1x128xf32>
      tpu.vector_store %arg5[%c0_34, %c0_35, %c0_36], %82 {strides = array<i32>} : memref<1x1x128xf32, #tpu.memory_space<vmem>>, vector<1x1x128xf32>,
    } else {
    }
    return
  }
  func.func @transform_0(%arg0: i32, %arg1: i32) -> (i32, i32) {
    %c1_i32 = arith.constant 1 : i32
    %0 = arith.muli %arg0, %c1_i32 : i32
    %1 = arith.addi %0, %arg1 : i32
    %c0_i32 = arith.constant 0 : i32
    %2 = arith.minsi %1, %c0_i32 : i32
    %c0_i32_0 = arith.constant 0 : i32
    %c0_i32_1 = arith.constant 0 : i32
    return %c0_i32_0, %2 : i32, i32
  }
  func.func @transform_1(%arg0: i32, %arg1: i32) -> (i32, i32) {
    %c1_i32 = arith.constant 1 : i32
    %0 = arith.muli %arg0, %c1_i32 : i32
    %1 = arith.addi %0, %arg1 : i32
    %c0_i32 = arith.constant 0 : i32
    %2 = arith.minsi %1, %c0_i32 : i32
    %c0_i32_0 = arith.constant 0 : i32
    %c0_i32_1 = arith.constant 0 : i32
    return %c0_i32_0, %2 : i32, i32
  }
  func.func @transform_2(%arg0: i32, %arg1: i32) -> (i32, i32) {
    %c0_i32 = arith.constant 0 : i32
    %c0_i32_0 = arith.constant 0 : i32
    %c0_i32_1 = arith.constant 0 : i32
    return %c0_i32, %c0_i32_0 : i32, i32
  }
  func.func @transform_3(%arg0: i32, %arg1: i32) -> (i32, i32, i32) {
    %c0_i32 = arith.constant 0 : i32
    %c0_i32_0 = arith.constant 0 : i32
    %c0_i32_1 = arith.constant 0 : i32
    return %arg0, %c0_i32, %c0_i32_0 : i32, i32, i32
  }
}

</mosaic_0001>

<bundles_post_ra>
// kernel: tpu_custom_call.1
= control target key start
LH: loop header
LB: loop body
LE: loop exit
PB: predicated region body
PF: predicated region fallthrough
CT: control target
= control target key end

     0   :  { %s306_s0 = inlined_call_operand.vmem [shape: f32[2,16], index: 0, kind: input, shape index: {}]   ;;  %s307_s1 = inlined_call_operand.vmem [shape: s32[1,16], index: 1, kind: input, shape index: {}]   ;;  %s308_s2 = inlined_call_operand.vmem [shape: f32[2,1], index: 2, kind: input, shape index: {}]   ;;  %s309_s3 = inlined_call_operand.hbm [shape: f32[1,1,128], index: 3, kind: output, shape index: {}]  }
   0x1   :  { %v74_v0 = vld [vmem:[%s308_s2] sm:$0x3] }
   0x2   :  { %8 = vsyncpa [#allocation5], 0  ;;  %v249_v1 = vmov 0   ;;  %vm75_vm0 = vcmask 1041408   ;;  %v72_v2 = vld [vmem:[%s306_s0] sm:$0x3]  ;;  %v93_v12 = vlaneseq }
   0x3   :  { %215 = vset.pattern.permute.xlu0 %v249_v1  ;;  %v76_v3 = vsel %vm75_vm0, %v72_v2, -inf  ;;  %v216_v15 = vld [vmem:[%s307_s1] ss:$0 sm:$0xff]  ;;  %v250_v17 = vmov 0.0   ;;  %vm153_vm5 = vcmask 1040384   ;;  %s189_s22 = sshll.u32 %s309_s3, 4  ;;  %s190_s22 = int_to_ptr.hbm [resolvable:$true] %s189_s22 }
   0x4   :  { %109 = vperm.xlu0 %215, %v74_v0   ;;  %v77_v4 = vrot.slane %v76_v3, 4  ;;  %v94_v14 = vshrl.u32 %v93_v12, 7  ;;  %70 = vst [vmem:[#allocation2] sm:$0x1] %v250_v17  ;;  %v284_v31 = vand.u32 127, %v93_v12 }
   0x5   :  { %71 = vst [vmem:[#allocation3] sm:$0x1] %v250_v17  ;;  %v73_v33 = vld [vmem:[%s307_s1] sm:$0x1]  ;;  %s251_s1 = smov [#allocation4]  }
   0x6   :  { %v78_v5 = vmax.f32 %v76_v3, %v77_v4  ;;  %vm96_vm1 = vcmp.eq.s32.totalorder %v94_v14, %v216_v15  ;;  %vm139_vm2 = vcmp.lt.s32.totalorder %v284_v31, 16  ;;  %vm138_vm3 = vcmp.ne.s32.totalorder %v73_v33, 4294967295  ;;  %s187_s18 = sshll.u32 %s251_s1, 4  ;;  %s188_s18 = int_to_ptr.vmem [resolvable:$true] %s187_s18 }
   0x7   :  { %v207_v18 = vsel %vm96_vm1, 1.0, %v250_v17  ;;  %vm290_vm4 = vmand %vm138_vm3, %vm139_vm2  ;;  %vm176_vm6 = vcmp.eq.s32.totalorder %v284_v31, 1  ;;  %vm175_vm7 = vcmp.eq.s32.totalorder %v284_v31, 0 }
   0x8   :  { %v79_v6 = vrot.slane %v78_v5, 2  ;;  %v99_v20 = vmul.f32 %v207_v18, %v72_v2  ;;  %v146_v38 = vsel %vm290_vm4, 1.0, %v250_v17 }
   0xa   :  { %v80_v7 = vmax.f32 %v78_v5, %v79_v6  ;;  %v100_v22 = vsel %vm75_vm0, %v99_v20, 0.0 }
   0xb   :  { %v101_v24 = vrot.slane %v100_v22, 4  ;;  %v141_v62 = vld [vmem:[#allocation2] sm:$0x1] }
   0xc   :  { %v81_v8 = vrot.slane %v80_v7, 1  ;;  %v145_v37 = vld [vmem:[#allocation3] sm:$0x1] }
   0xd   :  { %v102_v26 = vadd.f32 %v101_v24, %v100_v22  ;;  %v147_v41 = vadd.f32 %v146_v38, %v145_v37 }
   0xe   :  { %v82_v9 = vmax.f32 %v80_v7, %v81_v8 }
   0xf   :  { %v103_v28 = vrot.slane %v102_v26, 2  ;;  %148 = vst [vmem:[#allocation3] sm:$0x1] %v147_v41 }
  0x10   :  { %v83_v10 = vsub.f32 %v72_v2, %v82_v9 }
  0x11   :  { %v104_v30 = vadd.f32 %v103_v28, %v102_v26 }
  0x12   :  { %v84_v11 = vmul.f32 1.442695, %v83_v10 }
  0x13   :  { %v105_v32 = vrot.slane %v104_v30, 1 }
  0x14   :  { %217 = vpow2.f32 %v84_v11 }
  0x15   :  { %v106_v34 = vadd.f32 %v105_v32, %v104_v30 }
  0x16   :  { %v164_v44 = vld [vmem:[#allocation3] sm:$0x1] }
  0x17   :  { %v120_v39 = vsub.f32 %v106_v34, %v82_v9  ;;  %v165_v45 = vsel %vm153_vm5, %v164_v44, 0.0 }
  0x18   :  { %166 = vadd.xlane.f32.xlu1 %v165_v45 }
  0x1a   :  { %v218_v13 = vpop.eup %217 }
  0x1b   :  { %v86_v16 = vsel %vm75_vm0, %v218_v13, 0.0 }
  0x1c   :  { %v87_v19 = vrot.slane %v86_v16, 4 }
  0x1e   :  { %v88_v21 = vadd.f32 %v87_v19, %v86_v16 }
  0x20   :  { %v89_v23 = vrot.slane %v88_v21, 2 }
  0x22   :  { %v90_v25 = vadd.f32 %v89_v23, %v88_v21 }
  0x24   :  { %v91_v27 = vrot.slane %v90_v25, 1 }
  0x26   :  { %v92_v29 = vadd.f32 %v91_v27, %v90_v25 }
  0x28   :  { %219 = vlog2.f32 %v92_v29 }
  0x2e   :  { %v220_v35 = vpop.eup %219 }
  0x2f   :  { %v122_v40 = vmul.f32 0.6931472, %v220_v35 }
  0x31   :  { %v123_v42 = vsub.f32 %v120_v39, %v122_v40 }
  0x33   :  { %v124_v43 = vmul.f32 1.442695, %v123_v42 }
  0x35   :  { %221 = vpow2.f32 %v124_v43 }
  0x3b   :  { %v222_v48 = vpop.eup %221 }
  0x3c   :  { %v126_v52 = vsub.f32 1.0, %v222_v48 }
  0x3e   :  { %v127_v55 = vmax.f32 %v126_v52, 0.0 }
  0x40   :  { %v128_v58 = vmul.f32 %v127_v55, %v127_v55 }
  0x76   :  { %v110_v46 = vpop.permute.xlu0 %109 }
  0x77   :  { %v112_v47 = vmul.f32 %v207_v18, %v110_v46 }
  0x79   :  { %v113_v49 = vsel %vm75_vm0, %v112_v47, 0.0 }
  0x7a   :  { %v114_v50 = vrot.slane %v113_v49, 4 }
  0x7c   :  { %v115_v51 = vadd.f32 %v114_v50, %v113_v49 }
  0x7e   :  { %v116_v53 = vrot.slane %v115_v51, 2 }
  0x80   :  { %v117_v54 = vadd.f32 %v116_v53, %v115_v51 }
  0x82   :  { %v118_v56 = vrot.slane %v117_v54, 1 }
  0x84   :  { %v119_v57 = vadd.f32 %v118_v56, %v117_v54 }
  0x86   :  { %v129_v59 = vsub.f32 0.0, %v119_v57 }
  0x88   :  { %v130_v60 = vmul.f32 %v129_v59, %v128_v58 }
  0x8a   :  { %v131_v61 = vmul.f32 %v130_v60, %v123_v42 }
  0x8b   :  { %v167_v3 = vpop.xlane.xlu1 %166 }
  0x8c   :  { %v142_v63 = vsel %vm290_vm4, %v131_v61, 0.0  ;;  %v168_v4 = vrot.slane %v167_v3, 4 }
  0x8d   :  { %v143_v0 = vadd.f32 %v142_v63, %v141_v62 }
  0x8e   :  { %v169_v5 = vadd.f32 %v168_v4, %v167_v3 }
  0x8f   :  { %144 = vst [vmem:[#allocation2] sm:$0x1] %v143_v0 }
  0x90   :  { %v170_v6 = vrot.slane %v169_v5, 2 }
  0x92   :  { %v171_v10 = vadd.f32 %v170_v6, %v169_v5 }
  0x94   :  { %v172_v13 = vrot.slane %v171_v10, 1 }
  0x96   :  { %v152_v1 = vld [vmem:[#allocation2] sm:$0x1]  ;;  %v173_v16 = vadd.f32 %v172_v13, %v171_v10 }
  0x97   :  { %v154_v2 = vsel %vm153_vm5, %v152_v1, 0.0 }
  0x98   :  { %155 = vadd.xlane.f32.xlu0 %v154_v2 }
 0x10b   :  { %v156_v7 = vpop.xlane.xlu0 %155 }
 0x10c   :  { %v157_v8 = vrot.slane %v156_v7, 4 }
 0x10e   :  { %v158_v9 = vadd.f32 %v157_v8, %v156_v7 }
 0x110   :  { %v159_v11 = vrot.slane %v158_v9, 2 }
 0x112   :  { %v160_v12 = vadd.f32 %v159_v11, %v158_v9 }
 0x114   :  { %v161_v14 = vrot.slane %v160_v12, 1 }
 0x116   :  { %v162_v15 = vadd.f32 %v161_v14, %v160_v12 }
 0x118   :  { %208 = vpush %v162_v15 }
 0x119   :  { %210 = vpush %v173_v16 }
 0x149   :  { %s209_s19 = spop %208 }
 0x14a   :  { %v179_v17 = vstv %s209_s19  ;;  %s211_s23 = spop %210 }
 0x14b   :  { %v177_v18 = vstv %s211_s23 }
 0x14c   :  { %v178_v19 = vsel %vm176_vm6, %v177_v18, 0.0 }
 0x14d   :  { %v180_v20 = vsel %vm175_vm7, %v179_v17, %v178_v19 }
 0x14e   :  { %181 = vst [vmem:[#allocation4] sm:$0x1] %v180_v20 }
 0x14f   :  { %192 = dma.vmem_to_hbm [thread:$0]  %s188_s18, 16, %s190_s22, [#allocation5]  }
 0x150   :  { %247 = dma.done.wait [#allocation5], 16  }
 0x151   :  { %248 = vsyncadd [#allocation5], 4294967280 }
 0x152   :  { %197 = vsyncpa [#allocation5], 1 }

</bundles_post_ra>
